<compile_context>
chip_gen: v6e
topology: v6e:2x2x1
jax: 0.10.0
libtpu: 0.0.40
codegen_flags: <defaults>
</compile_context>

<pallas_src>
import functools
import jax
import jax.numpy as jnp
from jax.experimental import pallas as pl
from jax.experimental.pallas import tpu as pltpu

LN_EPS = 1e-5


def _round_up(x, m):
    return (x + m - 1) // m * m


def _layernorm(z, gamma, beta):
    mean = jnp.mean(z, axis=-1, keepdims=True)
    zc = z - mean
    var = jnp.mean(zc * zc, axis=-1, keepdims=True)
    inv = jax.lax.rsqrt(var + LN_EPS)
    return zc * inv * gamma + beta


# ---------------------------------------------------------------------------
# Fused kernel: whole d_inner resident, one pass per row tile (1-D grid).
# ---------------------------------------------------------------------------
def _ff_kernel_fused(x_ref, w1_ref, b1_ref, w2_ref, b2_ref, g_ref, be_ref,
                     o_ref, *, pre_lnorm, matmul_dtype):
    x = x_ref[...].astype(jnp.float32)                       # (tm, d_model)
    if pre_lnorm:
        cin = _layernorm(x, g_ref[...], be_ref[...])
    else:
        cin = x
    h = jnp.dot(cin.astype(matmul_dtype), w1_ref[...],
                preferred_element_type=jnp.float32)
    h = jnp.maximum(h + b1_ref[...], 0.0)                    # Linear + ReLU (+Dropout=id)
    y = jnp.dot(h.astype(matmul_dtype), w2_ref[...],
                preferred_element_type=jnp.float32) + b2_ref[...]
    if pre_lnorm:
        out = y + x
    else:
        out = _layernorm(x + y, g_ref[...], be_ref[...])
    o_ref[...] = out.astype(o_ref.dtype)


# ---------------------------------------------------------------------------
# Tiled kernel: d_inner streamed as a trailing reduction axis (2-D grid).
# ---------------------------------------------------------------------------
def _ff_kernel_tiled(x_ref, w1_ref, b1_ref, w2_ref, b2_ref, g_ref, be_ref,
                     o_ref, cin_ref, acc_ref, *, pre_lnorm, matmul_dtype):
    k = pl.program_id(1)
    nk = pl.num_programs(1)

    @pl.when(k == 0)
    def _init():
        x = x_ref[...].astype(jnp.float32)                   # (tm, d_model)
        if pre_lnorm:
            cin = _layernorm(x, g_ref[...], be_ref[...])
        else:
            cin = x
        cin_ref[...] = cin.astype(matmul_dtype)              # cached matmul LHS
        acc_ref[...] = jnp.zeros_like(acc_ref)

    # One d_inner slab: bf16 operands, f32 accumulation on the MXU.
    h = jnp.dot(cin_ref[...], w1_ref[...], preferred_element_type=jnp.float32)
    h = jnp.maximum(h + b1_ref[...], 0.0)
    acc_ref[...] += jnp.dot(h.astype(matmul_dtype), w2_ref[...],
                            preferred_element_type=jnp.float32)

    @pl.when(k == nk - 1)
    def _finalize():
        x = x_ref[...].astype(jnp.float32)
        y = acc_ref[...] + b2_ref[...]
        if pre_lnorm:
            out = y + x
        else:
            out = _layernorm(x + y, g_ref[...], be_ref[...])
        o_ref[...] = out.astype(o_ref.dtype)


# ---------------------------------------------------------------------------
# Tile chooser: prefer keeping the whole d_inner resident (weights DMA'd once);
# shrink the row tile before starting to stream d_inner slabs.
# ---------------------------------------------------------------------------
def _choose_tiles(n_rows, d_model, d_inner, matmul_bytes,
                  vmem_budget=40 * 1024 * 1024, max_inner_block=None):
    rows = _round_up(max(n_rows, 1), 8)
    di_full = _round_up(d_inner, 128)

    def usage(tm, tk):
        return (4 * tm * d_model * 4                  # x + out tiles (f32, 2 bufs each)
                + 4 * d_model * tk * matmul_bytes     # W1 + W2 slabs (2 bufs each)
                + tm * d_model * (matmul_bytes + 4)   # cin + acc scratch (tiled path)
                + tm * tk * (4 + matmul_bytes))       # h intermediate

    tk_candidates = [di_full]
    tk_candidates += [1 << p for p in range(13, 8, -1) if (1 << p) < di_full]
    if max_inner_block is not None:
        cap = _round_up(max_inner_block, 128)
        tk_candidates = sorted({min(tk, cap) for tk in tk_candidates},
                               reverse=True)

    for tk in tk_candidates:
        for tm in (512, 256, 128, 64, 32, 16, 8):
            if tm > rows:
                continue
            if usage(tm, tk) <= vmem_budget:
                return tm, tk
    return 8, 128


# ---------------------------------------------------------------------------
# Wrapper
# ---------------------------------------------------------------------------
def positionwise_ff(inp, w1, b1, w2, b2, gamma, beta, *, pre_lnorm=False,
                    matmul_dtype=jnp.bfloat16,
                    vmem_budget=40 * 1024 * 1024, max_inner_block=None):
    """inp: (seq, batch, d_model) float32. Weights stored as (in, out)."""
    seq, batch, d_model = inp.shape
    d_inner = w1.shape[1]
    n = seq * batch

    matmul_bytes = jnp.dtype(matmul_dtype).itemsize
    tm, tk = _choose_tiles(n, d_model, d_inner, matmul_bytes,
                           vmem_budget=vmem_budget,
                           max_inner_block=max_inner_block)

    n_pad = _round_up(n, tm)
    # Zero-padded W1 cols / W2 rows / b1 entries contribute exactly 0
    # (relu(0) @ 0), so padding d_inner leaves results unchanged.
    di_pad = _round_up(d_inner, tk)
    nk = di_pad // tk

    x2d = inp.reshape(n, d_model)
    if n_pad != n:
        x2d = jnp.pad(x2d, ((0, n_pad - n), (0, 0)))

    w1p, w2p, b1p = w1, w2, b1
    if di_pad != d_inner:
        w1p = jnp.pad(w1, ((0, 0), (0, di_pad - d_inner)))
        w2p = jnp.pad(w2, ((0, di_pad - d_inner), (0, 0)))
        b1p = jnp.pad(b1, ((0, di_pad - d_inner),))

    # Matmul operands in bf16 (halves weight DMA + VMEM); everything else f32.
    w1p = w1p.astype(matmul_dtype)
    w2p = w2p.astype(matmul_dtype)
    b1_2d = b1p.reshape(1, di_pad).astype(jnp.float32)
    b2_2d = b2.reshape(1, d_model).astype(jnp.float32)
    g2d = gamma.reshape(1, d_model).astype(jnp.float32)
    be2d = beta.reshape(1, d_model).astype(jnp.float32)

    cost = pl.CostEstimate(
        flops=4 * n_pad * d_model * di_pad,
        transcendentals=0,
        bytes_accessed=(2 * n_pad * d_model * 4
                        + (w1p.size + w2p.size) * matmul_bytes))

    out_shape = jax.ShapeDtypeStruct((n_pad, d_model), inp.dtype)
    vmem_limit = 64 * 1024 * 1024

    if nk == 1:
        # Fused path: weights fully resident, fetched once (constant index map).
        out2d = pl.pallas_call(
            functools.partial(_ff_kernel_fused, pre_lnorm=pre_lnorm,
                              matmul_dtype=matmul_dtype),
            out_shape=out_shape,
            grid_spec=pltpu.PrefetchScalarGridSpec(
                num_scalar_prefetch=0,
                grid=(n_pad // tm,),
                in_specs=[
                    pl.BlockSpec((tm, d_model), lambda i: (i, 0)),      # x tile
                    pl.BlockSpec((d_model, di_pad), lambda i: (0, 0)),  # W1
                    pl.BlockSpec((1, di_pad), lambda i: (0, 0)),        # b1
                    pl.BlockSpec((di_pad, d_model), lambda i: (0, 0)),  # W2
                    pl.BlockSpec((1, d_model), lambda i: (0, 0)),       # b2
                    pl.BlockSpec((1, d_model), lambda i: (0, 0)),       # gamma
                    pl.BlockSpec((1, d_model), lambda i: (0, 0)),       # beta
                ],
                out_specs=pl.BlockSpec((tm, d_model), lambda i: (i, 0))),
            compiler_params=pltpu.CompilerParams(
                dimension_semantics=("parallel",),
                vmem_limit_bytes=vmem_limit),
            cost_estimate=cost,
        )(x2d, w1p, b1_2d, w2p, b2_2d, g2d, be2d)
    else:
        # Tiled path: d_inner streamed as a trailing "arbitrary" reduction axis.
        out2d = pl.pallas_call(
            functools.partial(_ff_kernel_tiled, pre_lnorm=pre_lnorm,
                              matmul_dtype=matmul_dtype),
            out_shape=out_shape,
            grid_spec=pltpu.PrefetchScalarGridSpec(
                num_scalar_prefetch=0,
                grid=(n_pad // tm, nk),
                in_specs=[
                    pl.BlockSpec((tm, d_model), lambda i, k: (i, 0)),   # x tile
                    pl.BlockSpec((d_model, tk), lambda i, k: (0, k)),   # W1 slab
                    pl.BlockSpec((1, tk), lambda i, k: (0, k)),         # b1 slab
                    pl.BlockSpec((tk, d_model), lambda i, k: (k, 0)),   # W2 slab
                    pl.BlockSpec((1, d_model), lambda i, k: (0, 0)),    # b2
                    pl.BlockSpec((1, d_model), lambda i, k: (0, 0)),    # gamma
                    pl.BlockSpec((1, d_model), lambda i, k: (0, 0)),    # beta
                ],
                out_specs=pl.BlockSpec((tm, d_model), lambda i, k: (i, 0)),
                scratch_shapes=[
                    pltpu.VMEM((tm, d_model), matmul_dtype),   # cached core_in
                    pltpu.VMEM((tm, d_model), jnp.float32),    # f32 accumulator
                ]),
            compiler_params=pltpu.CompilerParams(
                dimension_semantics=("parallel", "arbitrary"),
                vmem_limit_bytes=vmem_limit),
            cost_estimate=cost,
        )(x2d, w1p, b1_2d, w2p, b2_2d, g2d, be2d)

    return out2d[:n].reshape(seq, batch, d_model)


# ---------------------------------------------------------------------------
# Pure-JAX reference
# ---------------------------------------------------------------------------
def _reference(inp, w1, b1, w2, b2, gamma, beta, pre_lnorm):
    def ln(z):
        m = jnp.mean(z, -1, keepdims=True)
        v = jnp.mean((z - m) ** 2, -1, keepdims=True)
        return (z - m) / jnp.sqrt(v + LN_EPS) * gamma + beta

    def core(x):
        h = jnp.maximum(x @ w1 + b1, 0.0)
        return h @ w2 + b2

    if pre_lnorm:
        return core(ln(inp)) + inp
    return ln(inp + core(inp))


if __name__ == "__main__":
    key = jax.random.PRNGKey(0)
    seq, batch, d_model = 8, 2, 32

    # (d_inner, max_inner_block): first case exercises the fused path,
    # second forces the tiled-reduction path (nk = 2).
    for d_inner, max_inner_block in ((64, None), (256, 128)):
        k_inp, k_w1, k_b1, k_w2, k_b2, key = jax.random.split(key, 6)

        inp = jax.random.normal(k_inp, (seq, batch, d_model), jnp.float32)
        # Deterministic nn.Linear-like init, stored as (in, out).
        w1 = jax.random.normal(k_w1, (d_model, d_inner), jnp.float32) / d_model ** 0.5
        b1 = jax.random.normal(k_b1, (d_inner,), jnp.float32) * 0.01
        w2 = jax.random.normal(k_w2, (d_inner, d_model), jnp.float32) / d_inner ** 0.5
        b2 = jax.random.normal(k_b2, (d_model,), jnp.float32) * 0.01
        gamma = jnp.ones((d_model,), jnp.float32)
        beta = jnp.zeros((d_model,), jnp.float32)

        for pre_lnorm in (False, True):
            ref = _reference(inp, w1, b1, w2, b2, gamma, beta, pre_lnorm)
            for dt, tol in ((jnp.float32, 1e-4), (jnp.bfloat16, 5e-2)):
                out = positionwise_ff(inp, w1, b1, w2, b2, gamma, beta,
                                      pre_lnorm=pre_lnorm, matmul_dtype=dt,
                                      max_inner_block=max_inner_block)
                out = jax.block_until_ready(out)
                assert out.shape == (seq, batch, d_model)
                err = jnp.max(jnp.abs(out - ref))
                assert jnp.allclose(out, ref, atol=tol, rtol=tol), (
                    f"mismatch d_inner={d_inner} pre_lnorm={pre_lnorm} "
                    f"dtype={jnp.dtype(dt).name}: max_err={err}")

    print("KERNEL_OK")
</pallas_src>

<mosaic_0001>
module attributes {stable_mosaic.version = 11 : i64} {
  func.func @_ff_kernel_fused(%arg0: i32, %arg1: memref<16x32xf32, #tpu.memory_space<vmem>>, %arg2: memref<32x128xf32, #tpu.memory_space<vmem>>, %arg3: memref<1x128xf32, #tpu.memory_space<vmem>>, %arg4: memref<128x32xf32, #tpu.memory_space<vmem>>, %arg5: memref<1x32xf32, #tpu.memory_space<vmem>>, %arg6: memref<1x32xf32, #tpu.memory_space<vmem>>, %arg7: memref<1x32xf32, #tpu.memory_space<vmem>>, %arg8: memref<16x32xf32, #tpu.memory_space<vmem>>) attributes {dimension_semantics = [#tpu.dimension_semantics<parallel>], iteration_bounds = array<i64: 1>, scalar_prefetch = 0 : i64, scratch_operands = 0 : i64, tpu.core_type = #tpu.core_type<tc>, window_params = [{transform_indices = @transform_0, window_bounds = array<i64: 16, 32>}, {pipeline_mode = #tpu.pipeline_mode<synchronous>, transform_indices = @transform_1, window_bounds = array<i64: 32, 128>}, {pipeline_mode = #tpu.pipeline_mode<synchronous>, transform_indices = @transform_2, window_bounds = array<i64: 1, 128>}, {pipeline_mode = #tpu.pipeline_mode<synchronous>, transform_indices = @transform_3, window_bounds = array<i64: 128, 32>}, {pipeline_mode = #tpu.pipeline_mode<synchronous>, transform_indices = @transform_4, window_bounds = array<i64: 1, 32>}, {pipeline_mode = #tpu.pipeline_mode<synchronous>, transform_indices = @transform_5, window_bounds = array<i64: 1, 32>}, {pipeline_mode = #tpu.pipeline_mode<synchronous>, transform_indices = @transform_6, window_bounds = array<i64: 1, 32>}, {transform_indices = @transform_7, window_bounds = array<i64: 16, 32>}]} {
    %c0 = arith.constant 0 : index
    %c0_0 = arith.constant 0 : index
    %0 = vector.load %arg1[%c0, %c0_0] : memref<16x32xf32, #tpu.memory_space<vmem>>, vector<16x32xf32>
    %c0_1 = arith.constant 0 : index
    %c0_2 = arith.constant 0 : index
    %1 = vector.load %arg2[%c0_1, %c0_2] : memref<32x128xf32, #tpu.memory_space<vmem>>, vector<32x128xf32>
    %cst = arith.constant dense<0.000000e+00> : vector<16x128xf32>
    %2 = tpu.matmul %0, %1, %cst {dimension_numbers = #tpu.dot_dimension_numbers<[1], [0], [0], [1], [0, 0, 1, 1], [], []>} : vector<16x32xf32>, vector<32x128xf32>, vector<16x128xf32> -> vector<16x128xf32>
    %c0_3 = arith.constant 0 : index
    %c0_4 = arith.constant 0 : index
    %3 = vector.load %arg3[%c0_3, %c0_4] : memref<1x128xf32, #tpu.memory_space<vmem>>, vector<1x128xf32>
    %4 = vector.broadcast %3 : vector<1x128xf32> to vector<16x128xf32>
    %5 = arith.addf %2, %4 : vector<16x128xf32>
    %cst_5 = arith.constant 0.000000e+00 : f32
    %6 = vector.broadcast %cst_5 : f32 to vector<16x128xf32>
    %7 = arith.maximumf %5, %6 : vector<16x128xf32>
    %c0_6 = arith.constant 0 : index
    %c0_7 = arith.constant 0 : index
    %8 = vector.load %arg4[%c0_6, %c0_7] : memref<128x32xf32, #tpu.memory_space<vmem>>, vector<128x32xf32>
    %cst_8 = arith.constant dense<0.000000e+00> : vector<16x32xf32>
    %9 = tpu.matmul %7, %8, %cst_8 {dimension_numbers = #tpu.dot_dimension_numbers<[1], [0], [0], [1], [0, 0, 1, 1], [], []>} : vector<16x128xf32>, vector<128x32xf32>, vector<16x32xf32> -> vector<16x32xf32>
    %c0_9 = arith.constant 0 : index
    %c0_10 = arith.constant 0 : index
    %10 = vector.load %arg5[%c0_9, %c0_10] : memref<1x32xf32, #tpu.memory_space<vmem>>, vector<1x32xf32>
    %11 = vector.broadcast %10 : vector<1x32xf32> to vector<16x32xf32>
    %12 = arith.addf %9, %11 : vector<16x32xf32>
    %13 = arith.addf %0, %12 : vector<16x32xf32>
    %c0_11 = arith.constant 0 : index
    %c0_12 = arith.constant 0 : index
    %14 = vector.load %arg6[%c0_11, %c0_12] : memref<1x32xf32, #tpu.memory_space<vmem>>, vector<1x32xf32>
    %c0_13 = arith.constant 0 : index
    %c0_14 = arith.constant 0 : index
    %15 = vector.load %arg7[%c0_13, %c0_14] : memref<1x32xf32, #tpu.memory_space<vmem>>, vector<1x32xf32>
    %cst_15 = arith.constant dense<0.000000e+00> : vector<16xf32>
    %16 = vector.multi_reduction <add>, %13, %cst_15 [1] : vector<16x32xf32> to vector<16xf32>
    %17 = vector.shape_cast %16 : vector<16xf32> to vector<16x1xf32>
    %cst_16 = arith.constant 3.200000e+01 : f32
    %18 = vector.broadcast %cst_16 : f32 to vector<16x1xf32>
    %19 = arith.divf %17, %18 : vector<16x1xf32>
    %20 = vector.broadcast %19 : vector<16x1xf32> to vector<16x32xf32>
    %21 = arith.subf %13, %20 : vector<16x32xf32>
    %22 = arith.mulf %21, %21 : vector<16x32xf32>
    %cst_17 = arith.constant dense<0.000000e+00> : vector<16xf32>
    %23 = vector.multi_reduction <add>, %22, %cst_17 [1] : vector<16x32xf32> to vector<16xf32>
    %24 = vector.shape_cast %23 : vector<16xf32> to vector<16x1xf32>
    %cst_18 = arith.constant 3.200000e+01 : f32
    %25 = vector.broadcast %cst_18 : f32 to vector<16x1xf32>
    %26 = arith.divf %24, %25 : vector<16x1xf32>
    %cst_19 = arith.constant 9.99999974E-6 : f32
    %27 = vector.broadcast %cst_19 : f32 to vector<16x1xf32>
    %28 = arith.addf %26, %27 : vector<16x1xf32>
    %29 = math.rsqrt %28 : vector<16x1xf32>
    %30 = vector.broadcast %29 : vector<16x1xf32> to vector<16x32xf32>
    %31 = arith.mulf %21, %30 : vector<16x32xf32>
    %32 = vector.broadcast %14 : vector<1x32xf32> to vector<16x32xf32>
    %33 = arith.mulf %31, %32 : vector<16x32xf32>
    %34 = vector.broadcast %15 : vector<1x32xf32> to vector<16x32xf32>
    %35 = arith.addf %33, %34 : vector<16x32xf32>
    %c0_20 = arith.constant 0 : index
    %c0_21 = arith.constant 0 : index
    %36 = vector.load %arg8[%c0_20, %c0_21] : memref<16x32xf32, #tpu.memory_space<vmem>>, vector<16x32xf32>
    tpu.vector_store %arg8[%c0_20, %c0_21], %35 {strides = array<i32>} : memref<16x32xf32, #tpu.memory_space<vmem>>, vector<16x32xf32>,
    return
  }
  func.func @transform_0(%arg0: i32) -> (i32, i32) {
    %c0_i32 = arith.constant 0 : i32
    %c0_i32_0 = arith.constant 0 : i32
    return %arg0, %c0_i32 : i32, i32
  }
  func.func @transform_1(%arg0: i32) -> (i32, i32) {
    %c0_i32 = arith.constant 0 : i32
    %c0_i32_0 = arith.constant 0 : i32
    %c0_i32_1 = arith.constant 0 : i32
    return %c0_i32, %c0_i32_0 : i32, i32
  }
  func.func @transform_2(%arg0: i32) -> (i32, i32) {
    %c0_i32 = arith.constant 0 : i32
    %c0_i32_0 = arith.constant 0 : i32
    %c0_i32_1 = arith.constant 0 : i32
    return %c0_i32, %c0_i32_0 : i32, i32
  }
  func.func @transform_3(%arg0: i32) -> (i32, i32) {
    %c0_i32 = arith.constant 0 : i32
    %c0_i32_0 = arith.constant 0 : i32
    %c0_i32_1 = arith.constant 0 : i32
    return %c0_i32, %c0_i32_0 : i32, i32
  }
  func.func @transform_4(%arg0: i32) -> (i32, i32) {
    %c0_i32 = arith.constant 0 : i32
    %c0_i32_0 = arith.constant 0 : i32
    %c0_i32_1 = arith.constant 0 : i32
    return %c0_i32, %c0_i32_0 : i32, i32
  }
  func.func @transform_5(%arg0: i32) -> (i32, i32) {
    %c0_i32 = arith.constant 0 : i32
    %c0_i32_0 = arith.constant 0 : i32
    %c0_i32_1 = arith.constant 0 : i32
    return %c0_i32, %c0_i32_0 : i32, i32
  }
  func.func @transform_6(%arg0: i32) -> (i32, i32) {
    %c0_i32 = arith.constant 0 : i32
    %c0_i32_0 = arith.constant 0 : i32
    %c0_i32_1 = arith.constant 0 : i32
    return %c0_i32, %c0_i32_0 : i32, i32
  }
  func.func @transform_7(%arg0: i32) -> (i32, i32) {
    %c0_i32 = arith.constant 0 : i32
    %c0_i32_0 = arith.constant 0 : i32
    return %arg0, %c0_i32 : i32, i32
  }
}

</mosaic_0001>

<bundles_post_ra>
// kernel: tpu_custom_call.1
= control target key start
LH: loop header
LB: loop body
LE: loop exit
PB: predicated region body
PF: predicated region fallthrough
CT: control target
= control target key end

     0   :  { %vm40_vm0 = vcmask 261120   ;;  %s532_s0 = inlined_call_operand.vmem [shape: f32[16,32], index: 0, kind: input, shape index: {}]   ;;  %s533_s1 = inlined_call_operand.vmem [shape: f32[32,128], index: 1, kind: input, shape index: {}]   ;;  %s534_s2 = inlined_call_operand.vmem [shape: f32[1,128], index: 2, kind: input, shape index: {}]   ;;  %s535_s3 = inlined_call_operand.vmem [shape: f32[128,32], index: 3, kind: input, shape index: {}]   ;;  %s536_s4 = inlined_call_operand.vmem [shape: f32[1,32], index: 4, kind: input, shape index: {}]   ;;  %s537_s5 = inlined_call_operand.vmem [shape: f32[1,32], index: 5, kind: input, shape index: {}]   ;;  %s538_s6 = inlined_call_operand.vmem [shape: f32[1,32], index: 6, kind: input, shape index: {}]   ;;  %s539_s7 = inlined_call_operand.hbm [shape: f32[16,32], index: 7, kind: output, shape index: {}]  }
   0x1   :  { %v32_v0 = vld [vmem:[%s533_s1 + $0x18] sm:$0xff]  ;;  %v31_v1 = vld [vmem:[%s533_s1 + $0x10] sm:$0xff]  ;;  %v444_v2 = vld [vmem:[%s532_s0] sm:$0xff] }
   0x2   :  { %317 = vmatprep.subr.mxu0 %v32_v0  ;;  %v30_v3 = vld [vmem:[%s533_s1 + $0x8] sm:$0xff]  ;;  %325 = vmatprep.mubr.msk.f32.mxu0 %vm40_vm0, %v444_v2  ;;  %v139_v4 = vld [vmem:[%s535_s3 + $0x78] sm:$0xff]  ;;  %v138_v5 = vld [vmem:[%s535_s3 + $0x70] sm:$0xff] }
   0x3   :  { %318 = vmatpush3.msra.mxu0 %v32_v0  ;;  %328 = vmatprep.subr.mxu1 %v139_v4  ;;  %v29_v6 = vld [vmem:[%s533_s1] sm:$0xff]  ;;  %v137_v7 = vld [vmem:[%s535_s3 + $0x68] sm:$0xff] }
   0x4   :  { %319 = vmatprep.subr.mxu0 %v31_v1  ;;  %329 = vmatpush3.msra.mxu1 %v139_v4  ;;  %v466_v8 = vld [vmem:[%s532_s0 + $0x8] sm:$0xff]  ;;  %v136_v9 = vld [vmem:[%s535_s3 + $0x60] sm:$0xff] }
   0x5   :  { %320 = vmatpush3.msra.mxu0 %v31_v1  ;;  %330 = vmatprep.subr.mxu1 %v138_v5 }
   0x6   :  { %321 = vmatprep.subr.mxu0 %v30_v3  ;;  %331 = vmatpush3.msra.mxu1 %v138_v5 }
   0x7   :  { %322 = vmatpush3.msra.mxu0 %v30_v3 }
   0x8   :  { %12 = vsyncpa [#allocation3], 0  ;;  %323 = vmatprep.subr.mxu0 %v29_v6  ;;  %332 = vmatprep.subr.mxu1 %v137_v7  ;;  %v135_v10 = vld [vmem:[%s535_s3 + $0x58] sm:$0xff]  ;;  %v134_v11 = vld [vmem:[%s535_s3 + $0x50] sm:$0xff]  ;;  %s392_s23 = smov [#allocation2]  }
   0x9   :  { %324 = vmatpush3.msra.mxu0 %v29_v6  ;;  %333 = vmatpush3.msra.mxu1 %v137_v7  ;;  %v133_v12 = vld [vmem:[%s535_s3 + $0x48] sm:$0xff]  ;;  %v132_v13 = vld [vmem:[%s535_s3 + $0x40] sm:$0xff]  ;;  %v131_v14 = vld [vmem:[%s535_s3 + $0x38] sm:$0xff]  ;;  %s276_s24 = sshll.u32 %s392_s23, 4  ;;  %s277_s24 = int_to_ptr.vmem [resolvable:$true] %s276_s24 }
   0xa   :  { %326 = vmatmul.mubr.msk.f32.vlgmr.msra.gmra.mxu0 %vm40_vm0, %v466_v8  ;;  %334 = vmatprep.subr.mxu1 %v136_v9  ;;  %v130_v15 = vld [vmem:[%s535_s3 + $0x30] sm:$0xff]  ;;  %v129_v16 = vld [vmem:[%s535_s3 + $0x28] sm:$0xff]  ;;  %v128_v17 = vld [vmem:[%s535_s3 + $0x20] sm:$0xff]  ;;  %s370_s25 = scalar_lea.vmem %s277_s24, 256  ;;  %p375_p1 = scmp.lt.s32.totalorder %s277_s24, %s277_s24 }
   0xb   :  { %335 = vmatpush3.msra.mxu1 %v136_v9  ;;  %v127_v18 = vld [vmem:[%s535_s3 + $0x18] sm:$0xff]  ;;  %v126_v19 = vld [vmem:[%s535_s3 + $0x10] sm:$0xff]  ;;  %v125_v20 = vld [vmem:[%s535_s3 + $0x8] sm:$0xff]  ;;  %p371_p0 = scmp.ne.s32.totalorder %s277_s24, %s370_s25  ;;  %p376_p2 = scmp.lt.s32.totalorder %s370_s25, %s370_s25 }
   0xc   :  { %336 = vmatprep.subr.mxu1 %v135_v10  ;;  %v124_v21 = vld [vmem:[%s535_s3] sm:$0xff] }
   0xd   :  { %337 = vmatpush3.msra.mxu1 %v135_v10  ;;  %v287_v22 = vld [vmem:[%s534_s2] ss:$0 sm:$0xff]  ;;  %p377_p3 = por %p376_p2, %p375_p1 }
   0xe   :  { %338 = vmatprep.subr.mxu1 %v134_v11  ;;  %v290_v30 = vld [vmem:[%s536_s4] ss:$0 sm:$0xff] }
   0xf   :  { %339 = vmatpush3.msra.mxu1 %v134_v11  ;;  %v291_v55 = vld [vmem:[%s537_s5] ss:$0 sm:$0xff]  ;;  %p378_p4 = pnand %p377_p3, %p371_p0 }
  0x10   :  { %340 = vmatprep.subr.mxu1 %v133_v12  ;;  %v292_v57 = vld [vmem:[%s538_s6] ss:$0 sm:$0xff] }
  0x11   :  { %341 = vmatpush3.msra.mxu1 %v133_v12 }
  0x12   :  { %342 = vmatprep.subr.mxu1 %v132_v13 }
  0x13   :  { %343 = vmatpush3.msra.mxu1 %v132_v13 }
  0x14   :  { %344 = vmatprep.subr.mxu1 %v131_v14 }
  0x15   :  { %345 = vmatpush3.msra.mxu1 %v131_v14 }
  0x16   :  { %346 = vmatprep.subr.mxu1 %v130_v15 }
  0x17   :  { %347 = vmatpush3.msra.mxu1 %v130_v15 }
  0x18   :  { %348 = vmatprep.subr.mxu1 %v129_v16 }
  0x19   :  { %349 = vmatpush3.msra.mxu1 %v129_v16 }
  0x1a   :  { %350 = vmatprep.subr.mxu1 %v128_v17 }
  0x1b   :  { %351 = vmatpush3.msra.mxu1 %v128_v17 }
  0x1c   :  { %352 = vmatprep.subr.mxu1 %v127_v18 }
  0x1d   :  { %353 = vmatpush3.msra.mxu1 %v127_v18 }
  0x1e   :  { %354 = vmatprep.subr.mxu1 %v126_v19 }
  0x1f   :  { %355 = vmatpush3.msra.mxu1 %v126_v19 }
  0x20   :  { %356 = vmatprep.subr.mxu1 %v125_v20 }
  0x21   :  { %357 = vmatpush3.msra.mxu1 %v125_v20 }
  0x22   :  { %358 = vmatprep.subr.mxu1 %v124_v21 }
  0x23   :  { %359 = vmatpush3.msra.mxu1 %v124_v21 }
  0xca   :  { %v327_v23 = vpop.f32.mrf.mxu0 }
  0xcb   :  { %v119_v24 = vadd.f32 %v327_v23, %v287_v22 }
  0xcc   :  { %v113_v25 = vpop.f32.mrf.mxu0 }
  0xcd   :  { %v114_v26 = vadd.f32 %v287_v22, %v113_v25  ;;  %v123_v28 = vmax.f32 %v119_v24, 0.0 }
  0xcf   :  { %v122_v27 = vmax.f32 %v114_v26, 0.0 }
  0xd1   :  { %360 = vmatprep.mubr.f32.mxu1 %v122_v27 }
  0xd2   :  { %361 = vmatmul.mubr.f32.vlgmr.msra.gmra.mxu1 %v123_v28 }
 0x192   :  { %v362_v29 = vpop.f32.mrf.mxu1 }
 0x193   :  { %v219_v32 = vadd.f32 %v362_v29, %v290_v30 }
 0x194   :  { %v213_v31 = vpop.f32.mrf.mxu1 }
 0x195   :  { %v214_v33 = vadd.f32 %v290_v30, %v213_v31  ;;  %v223_v36 = vadd.f32 %v219_v32, %v466_v8 }
 0x197   :  { %v222_v34 = vadd.f32 %v214_v33, %v444_v2  ;;  %v229_v37 = vsel %vm40_vm0, %v223_v36, 0.0 }
 0x199   :  { %v226_v35 = vsel %vm40_vm0, %v222_v34, 0.0 }
 0x19a   :  { %227 = vadd.xlane.f32.xlu0 %v226_v35 }
 0x19e   :  { %230 = vadd.xlane.f32.xlu0 %v229_v37 }
 0x223   :  { %v228_v38 = vpop.xlane.xlu0 %227 }
 0x224   :  { %v233_v39 = vmul.f32 0.03125, %v228_v38 }
 0x226   :  { %v235_v40 = vsub.f32 %v222_v34, %v233_v39 }
 0x227   :  { %v231_v41 = vpop.xlane.xlu0 %230 }
 0x228   :  { %v234_v42 = vmul.f32 0.03125, %v231_v41  ;;  %v237_v43 = vmul.f32 %v235_v40, %v235_v40 }
 0x22a   :  { %v236_v44 = vsub.f32 %v223_v36, %v234_v42  ;;  %v239_v45 = vsel %vm40_vm0, %v237_v43, 0.0 }
 0x22b   :  { %240 = vadd.xlane.f32.xlu1 %v239_v45 }
 0x22c   :  { %v238_v46 = vmul.f32 %v236_v44, %v236_v44 }
 0x22e   :  { %v242_v47 = vsel %vm40_vm0, %v238_v46, 0.0 }
 0x22f   :  { %243 = vadd.xlane.f32.xlu1 %v242_v47 }
 0x2b4   :  { %v241_v48 = vpop.xlane.xlu1 %240 }
 0x2b5   :  { %v245_v49 = vmul.f32 0.03125, %v241_v48 }
 0x2b7   :  { %v247_v50 = vadd.f32 1e-05, %v245_v49 }
 0x2b8   :  { %v244_v51 = vpop.xlane.xlu1 %243 }
 0x2b9   :  { %366 = vrsqrt.f32 %v247_v50  ;;  %v246_v52 = vmul.f32 0.03125, %v244_v51 }
 0x2bb   :  { %v248_v53 = vadd.f32 1e-05, %v246_v52 }
 0x2bd   :  { %368 = vrsqrt.f32 %v248_v53 }
 0x2c6   :  { %v367_v54 = vpop.eup %366 }
 0x2c7   :  { %v251_v56 = vmul.f32 %v367_v54, %v235_v40 }
 0x2c9   :  { %v259_v58 = vmul.f32 %v291_v55, %v251_v56 }
 0x2ca   :  { %v369_v59 = vpop.eup %368 }
 0x2cb   :  { %v252_v60 = vmul.f32 %v369_v59, %v236_v44  ;;  %v267_v61 = vadd.f32 %v292_v57, %v259_v58 }
 0x2cd   :  { %v260_v62 = vmul.f32 %v291_v55, %v252_v60  ;;  %269 = vst.msk [vmem:[#allocation2] sm:$0xff] %vm40_vm0, %v267_v61 }
 0x2cf   :  { %v268_v63 = vadd.f32 %v292_v57, %v260_v62 }
 0x2d1   :  { %270 = vst.msk [vmem:[#allocation2 + $0x8] sm:$0xff] %vm40_vm0, %v268_v63 }
 0x2d2   :  { %381 = shalt.err (!%p378_p4)
}
 0x2d3   :  { %s393_s5 = smov 128   ;;  %s394_s6 = smov 8  }
 0x2d4   :  { %282 = dma.vmem_to_hbm [thread:$0]  %s277_s24, 256, %s539_s7, [#allocation3], %s393_s5, %s393_s5, %s394_s6  }
 0x2d5   :  { %390 = dma.done.wait [#allocation3], 256  }
 0x2d6   :  { %391 = vsyncadd [#allocation3], 4294967040 }
 0x2d7   :  { %286 = vsyncpa [#allocation3], 1 }

</bundles_post_ra>
